<compile_context>
chip_gen: v7x
topology: tpu7x:2x2x1
jax: 0.10.0
libtpu: 0.0.40
codegen_flags: <defaults>
</compile_context>

<pallas_src>
import jax
import jax.numpy as jnp
from jax.experimental import pallas as pl
from jax.experimental.pallas import tpu as pltpu

D_IN = 500        # reverse_feature width
K_PAD = 512       # lane-aligned layer-1 contraction dim
H1 = 256
H2 = 64
H2_PAD = 128      # lane-aligned hidden-2 width
D_OUT = 2
_LANE = 128


# ----------------------------------------------------------------------------
# Kernel
# ----------------------------------------------------------------------------
def _mlp_kernel(x_ref, w1_ref, b1_ref, w2_ref, b2_ref, w3_ref, b3_ref,
                o_ref, xp_ref):
    # x_ref: (tm, 500) batch tile in the caller's dtype (f32 or bf16).
    # Weights are bf16 (padded), biases f32. xp_ref: (tm, 512) bf16 scratch.
    tm = xp_ref.shape[0]

    # In-kernel pad 500 -> 512 + cast to bf16:
    #   1) zero the last aligned 128-lane tile of the scratch,
    #   2) overwrite lanes [0, 500) with the cast input (masked tail store).
    # Lanes [500, 512) stay zero, so the padding is inert for the matmul.
    # (Re-zeroed every step so per-core scratch instances are always valid.)
    xp_ref[:, K_PAD - _LANE:] = jnp.zeros((tm, _LANE), jnp.bfloat16)
    xp_ref[:, :D_IN] = x_ref[...].astype(jnp.bfloat16)
    x = xp_ref[...]                                                 # (tm, 512)

    # Layer 1: (tm,512) @ (512,256) -> f32 acc; bias + ReLU in f32.
    h1 = jnp.dot(x, w1_ref[...], preferred_element_type=jnp.float32)
    h1 = jnp.maximum(h1 + b1_ref[...], 0.0).astype(jnp.bfloat16)    # (tm,256)

    # Layer 2: (tm,256) @ (256,128) (64 real lanes + 64 zero-padded lanes).
    h2 = jnp.dot(h1, w2_ref[...], preferred_element_type=jnp.float32)
    h2 = jnp.maximum(h2 + b2_ref[...], 0.0).astype(jnp.bfloat16)    # (tm,128)

    # Layer 3: (tm,128) @ (128,2); padded rows of W3 are zero.
    logits = jnp.dot(h2, w3_ref[...], preferred_element_type=jnp.float32)
    o_ref[...] = (logits + b3_ref[...]).astype(o_ref.dtype)         # (tm,2)


# ----------------------------------------------------------------------------
# Wrapper
# ----------------------------------------------------------------------------
def pack_params(params):
    """Pad params to lane-aligned shapes and cast weights to bf16 (done once).

    Input (f32, [in,out] layout):
      w1 [500,256], b1 [1,256], w2 [256,64], b2 [1,64], w3 [64,2], b3 [1,2]
    Output (padded):
      w1 [512,256] bf16, b1 [1,256] f32,
      w2 [256,128] bf16, b2 [1,128] f32,
      w3 [128,  2] bf16, b3 [1,  2] f32
    Zero padding is inert: padded x lanes (zeroed in-kernel) hit padded W1
    rows; padded h2 lanes are ReLU(0+0)=0 and hit zero W3 rows.
    """
    w1, b1, w2, b2, w3, b3 = params
    w1p = jnp.pad(w1, ((0, K_PAD - w1.shape[0]), (0, 0))).astype(jnp.bfloat16)
    w2p = jnp.pad(w2, ((0, 0), (0, H2_PAD - w2.shape[1]))).astype(jnp.bfloat16)
    b2p = jnp.pad(b2, ((0, 0), (0, H2_PAD - b2.shape[1]))).astype(jnp.float32)
    w3p = jnp.pad(w3, ((0, H2_PAD - w3.shape[0]), (0, 0))).astype(jnp.bfloat16)
    return (w1p, b1.astype(jnp.float32), w2p, b2p, w3p, b3.astype(jnp.float32))


def _pick_tm(B):
    # Large batches: big tiles (multiple of 256) amortize the ~0.35us/step
    # pipeline overhead.  TODO(synk): sweep 512-2048 per chip; keep f32-input
    # tm <= 4096 on v7x (64 MiB physical VMEM).
    if B >= 1024:
        return 1024
    if B >= 256:
        return ((B + 255) // 256) * 256
    # Tiny batches: multiple of 16 (bf16 sublane packing).  Note: at B <~ 64
    # the call is launch + weight-DMA bound; batch requests upstream (or use a
    # plain XLA matmul path) if that latency matters.
    return max(16, ((B + 15) // 16) * 16)


def model_d_forward(x, packed_params):
    """x: [B, 500] float32 (or bfloat16 -- streamed as-is, halves HBM reads).

    packed_params: from pack_params().  Returns [B, 2] float32 logits.
    Dropout layers run in eval mode (identity).
    """
    w1, b1, w2, b2, w3, b3 = packed_params
    B = x.shape[0]
    assert x.shape[1] == D_IN, x.shape
    tm = _pick_tm(B)

    const = lambda i: (0, 0)   # weights/biases: same block every step -> fetched once
    return pl.pallas_call(
        _mlp_kernel,
        out_shape=jax.ShapeDtypeStruct((B, D_OUT), jnp.float32),
        grid=(pl.cdiv(B, tm),),
        in_specs=[
            pl.BlockSpec((tm, D_IN), lambda i: (i, 0)),   # x: streamed natively
            pl.BlockSpec(w1.shape, const),
            pl.BlockSpec(b1.shape, const),
            pl.BlockSpec(w2.shape, const),
            pl.BlockSpec(b2.shape, const),
            pl.BlockSpec(w3.shape, const),
            pl.BlockSpec(b3.shape, const),
        ],
        out_specs=pl.BlockSpec((tm, D_OUT), lambda i: (i, 0)),
        scratch_shapes=[pltpu.VMEM((tm, K_PAD), jnp.bfloat16)],
        compiler_params=pltpu.CompilerParams(
            dimension_semantics=("parallel",),   # shard batch tiles across v7x cores
            vmem_limit_bytes=24 << 20,           # room for tm up to ~2048 (f32 input)
        ),
    )(x, w1, b1, w2, b2, w3, b3)


# ----------------------------------------------------------------------------
# Init + reference
# ----------------------------------------------------------------------------
def init_params(key):
    """PyTorch nn.Linear-style init (U[-1/sqrt(fan_in), +]), [in,out] layout, f32."""
    dims = [(D_IN, H1), (H1, H2), (H2, D_OUT)]
    params = []
    for fan_in, fan_out in dims:
        key, kw, kb = jax.random.split(key, 3)
        bound = 1.0 / (fan_in ** 0.5)
        w = jax.random.uniform(kw, (fan_in, fan_out), jnp.float32, -bound, bound)
        b = jax.random.uniform(kb, (1, fan_out), jnp.float32, -bound, bound)
        params.extend([w, b])
    return tuple(params)


def _reference(x, params):
    w1, b1, w2, b2, w3, b3 = params
    h1 = jnp.maximum(x @ w1 + b1, 0.0)
    h2 = jnp.maximum(h1 @ w2 + b2, 0.0)
    return h2 @ w3 + b3


if __name__ == "__main__":
    key = jax.random.PRNGKey(0)
    key, kx = jax.random.split(key)

    B = 8
    x = jax.random.normal(kx, (B, D_IN), jnp.float32)   # reverse_feature
    params = init_params(key)
    packed = pack_params(params)

    logits = model_d_forward(x, packed)
    logits = jax.block_until_ready(logits)

    ref = _reference(x, params)   # f32 reference (unpadded params)
    assert logits.shape == (B, D_OUT), logits.shape
    assert jnp.allclose(logits, ref, atol=3e-2, rtol=3e-2), "mismatch vs reference"

    print("KERNEL_OK")
</pallas_src>

<mosaic_0001>
module attributes {stable_mosaic.version = 11 : i64} {
  func.func @_mlp_kernel(%arg0: i32, %arg1: memref<16x500xf32, #tpu.memory_space<vmem>>, %arg2: memref<512x256xbf16, #tpu.memory_space<vmem>>, %arg3: memref<1x256xf32, #tpu.memory_space<vmem>>, %arg4: memref<256x128xbf16, #tpu.memory_space<vmem>>, %arg5: memref<1x128xf32, #tpu.memory_space<vmem>>, %arg6: memref<128x2xbf16, #tpu.memory_space<vmem>>, %arg7: memref<1x2xf32, #tpu.memory_space<vmem>>, %arg8: memref<16x2xf32, #tpu.memory_space<vmem>>, %arg9: memref<16x512xbf16, #tpu.memory_space<vmem>>) attributes {dimension_semantics = [#tpu.dimension_semantics<parallel>], iteration_bounds = array<i64: 1>, scalar_prefetch = 0 : i64, scratch_operands = 1 : i64, tpu.core_type = #tpu.core_type<tc>, window_params = [{transform_indices = @transform_0, window_bounds = array<i64: 16, 500>}, {pipeline_mode = #tpu.pipeline_mode<synchronous>, transform_indices = @transform_1, window_bounds = array<i64: 512, 256>}, {pipeline_mode = #tpu.pipeline_mode<synchronous>, transform_indices = @transform_2, window_bounds = array<i64: 1, 256>}, {pipeline_mode = #tpu.pipeline_mode<synchronous>, transform_indices = @transform_3, window_bounds = array<i64: 256, 128>}, {pipeline_mode = #tpu.pipeline_mode<synchronous>, transform_indices = @transform_4, window_bounds = array<i64: 1, 128>}, {pipeline_mode = #tpu.pipeline_mode<synchronous>, transform_indices = @transform_5, window_bounds = array<i64: 128, 2>}, {pipeline_mode = #tpu.pipeline_mode<synchronous>, transform_indices = @transform_6, window_bounds = array<i64: 1, 2>}, {transform_indices = @transform_7, window_bounds = array<i64: 16, 2>}]} {
    %cst = arith.constant 0.000000e+00 : bf16
    %0 = vector.broadcast %cst : bf16 to vector<16x128xbf16>
    %c0 = arith.constant 0 : index
    %c384 = arith.constant 384 : index
    %1 = vector.load %arg9[%c0, %c384] : memref<16x512xbf16, #tpu.memory_space<vmem>>, vector<16x128xbf16>
    tpu.vector_store %arg9[%c0, %c384], %0 {strides = array<i32>} : memref<16x512xbf16, #tpu.memory_space<vmem>>, vector<16x128xbf16>,
    %c0_0 = arith.constant 0 : index
    %c0_1 = arith.constant 0 : index
    %2 = vector.load %arg1[%c0_0, %c0_1] : memref<16x500xf32, #tpu.memory_space<vmem>>, vector<16x500xf32>
    %3 = arith.truncf %2 : vector<16x500xf32> to vector<16x500xbf16>
    %c0_2 = arith.constant 0 : index
    %c0_3 = arith.constant 0 : index
    %4 = vector.load %arg9[%c0_2, %c0_3] : memref<16x512xbf16, #tpu.memory_space<vmem>>, vector<16x500xbf16>
    tpu.vector_store %arg9[%c0_2, %c0_3], %3 {strides = array<i32>} : memref<16x512xbf16, #tpu.memory_space<vmem>>, vector<16x500xbf16>,
    %c0_4 = arith.constant 0 : index
    %c0_5 = arith.constant 0 : index
    %5 = vector.load %arg9[%c0_4, %c0_5] : memref<16x512xbf16, #tpu.memory_space<vmem>>, vector<16x512xbf16>
    %c0_6 = arith.constant 0 : index
    %c0_7 = arith.constant 0 : index
    %6 = vector.load %arg2[%c0_6, %c0_7] : memref<512x256xbf16, #tpu.memory_space<vmem>>, vector<512x256xbf16>
    %cst_8 = arith.constant dense<0.000000e+00> : vector<16x256xf32>
    %7 = tpu.matmul %5, %6, %cst_8 {dimension_numbers = #tpu.dot_dimension_numbers<[1], [0], [0], [1], [0, 0, 1, 1], [], []>} : vector<16x512xbf16>, vector<512x256xbf16>, vector<16x256xf32> -> vector<16x256xf32>
    %c0_9 = arith.constant 0 : index
    %c0_10 = arith.constant 0 : index
    %8 = vector.load %arg3[%c0_9, %c0_10] : memref<1x256xf32, #tpu.memory_space<vmem>>, vector<1x256xf32>
    %9 = vector.broadcast %8 : vector<1x256xf32> to vector<16x256xf32>
    %10 = arith.addf %7, %9 : vector<16x256xf32>
    %cst_11 = arith.constant 0.000000e+00 : f32
    %11 = vector.broadcast %cst_11 : f32 to vector<16x256xf32>
    %12 = arith.maximumf %10, %11 : vector<16x256xf32>
    %13 = arith.truncf %12 : vector<16x256xf32> to vector<16x256xbf16>
    %c0_12 = arith.constant 0 : index
    %c0_13 = arith.constant 0 : index
    %14 = vector.load %arg4[%c0_12, %c0_13] : memref<256x128xbf16, #tpu.memory_space<vmem>>, vector<256x128xbf16>
    %cst_14 = arith.constant dense<0.000000e+00> : vector<16x128xf32>
    %15 = tpu.matmul %13, %14, %cst_14 {dimension_numbers = #tpu.dot_dimension_numbers<[1], [0], [0], [1], [0, 0, 1, 1], [], []>} : vector<16x256xbf16>, vector<256x128xbf16>, vector<16x128xf32> -> vector<16x128xf32>
    %c0_15 = arith.constant 0 : index
    %c0_16 = arith.constant 0 : index
    %16 = vector.load %arg5[%c0_15, %c0_16] : memref<1x128xf32, #tpu.memory_space<vmem>>, vector<1x128xf32>
    %17 = vector.broadcast %16 : vector<1x128xf32> to vector<16x128xf32>
    %18 = arith.addf %15, %17 : vector<16x128xf32>
    %cst_17 = arith.constant 0.000000e+00 : f32
    %19 = vector.broadcast %cst_17 : f32 to vector<16x128xf32>
    %20 = arith.maximumf %18, %19 : vector<16x128xf32>
    %21 = arith.truncf %20 : vector<16x128xf32> to vector<16x128xbf16>
    %c0_18 = arith.constant 0 : index
    %c0_19 = arith.constant 0 : index
    %22 = vector.load %arg6[%c0_18, %c0_19] : memref<128x2xbf16, #tpu.memory_space<vmem>>, vector<128x2xbf16>
    %cst_20 = arith.constant dense<0.000000e+00> : vector<16x2xf32>
    %23 = tpu.matmul %21, %22, %cst_20 {dimension_numbers = #tpu.dot_dimension_numbers<[1], [0], [0], [1], [0, 0, 1, 1], [], []>} : vector<16x128xbf16>, vector<128x2xbf16>, vector<16x2xf32> -> vector<16x2xf32>
    %c0_21 = arith.constant 0 : index
    %c0_22 = arith.constant 0 : index
    %24 = vector.load %arg7[%c0_21, %c0_22] : memref<1x2xf32, #tpu.memory_space<vmem>>, vector<1x2xf32>
    %25 = vector.broadcast %24 : vector<1x2xf32> to vector<16x2xf32>
    %26 = arith.addf %23, %25 : vector<16x2xf32>
    %c0_23 = arith.constant 0 : index
    %c0_24 = arith.constant 0 : index
    %27 = vector.load %arg8[%c0_23, %c0_24] : memref<16x2xf32, #tpu.memory_space<vmem>>, vector<16x2xf32>
    tpu.vector_store %arg8[%c0_23, %c0_24], %26 {strides = array<i32>} : memref<16x2xf32, #tpu.memory_space<vmem>>, vector<16x2xf32>,
    return
  }
  func.func @transform_0(%arg0: i32) -> (i32, i32) {
    %c0_i32 = arith.constant 0 : i32
    %c0_i32_0 = arith.constant 0 : i32
    return %arg0, %c0_i32 : i32, i32
  }
  func.func @transform_1(%arg0: i32) -> (i32, i32) {
    %c0_i32 = arith.constant 0 : i32
    %c0_i32_0 = arith.constant 0 : i32
    %c0_i32_1 = arith.constant 0 : i32
    return %c0_i32, %c0_i32_0 : i32, i32
  }
  func.func @transform_2(%arg0: i32) -> (i32, i32) {
    %c0_i32 = arith.constant 0 : i32
    %c0_i32_0 = arith.constant 0 : i32
    %c0_i32_1 = arith.constant 0 : i32
    return %c0_i32, %c0_i32_0 : i32, i32
  }
  func.func @transform_3(%arg0: i32) -> (i32, i32) {
    %c0_i32 = arith.constant 0 : i32
    %c0_i32_0 = arith.constant 0 : i32
    %c0_i32_1 = arith.constant 0 : i32
    return %c0_i32, %c0_i32_0 : i32, i32
  }
  func.func @transform_4(%arg0: i32) -> (i32, i32) {
    %c0_i32 = arith.constant 0 : i32
    %c0_i32_0 = arith.constant 0 : i32
    %c0_i32_1 = arith.constant 0 : i32
    return %c0_i32, %c0_i32_0 : i32, i32
  }
  func.func @transform_5(%arg0: i32) -> (i32, i32) {
    %c0_i32 = arith.constant 0 : i32
    %c0_i32_0 = arith.constant 0 : i32
    %c0_i32_1 = arith.constant 0 : i32
    return %c0_i32, %c0_i32_0 : i32, i32
  }
  func.func @transform_6(%arg0: i32) -> (i32, i32) {
    %c0_i32 = arith.constant 0 : i32
    %c0_i32_0 = arith.constant 0 : i32
    %c0_i32_1 = arith.constant 0 : i32
    return %c0_i32, %c0_i32_0 : i32, i32
  }
  func.func @transform_7(%arg0: i32) -> (i32, i32) {
    %c0_i32 = arith.constant 0 : i32
    %c0_i32_0 = arith.constant 0 : i32
    return %arg0, %c0_i32 : i32, i32
  }
}

</mosaic_0001>

<bundles_post_ra>
// kernel: tpu_custom_call.1
= control target key start
LH: loop header
LB: loop body
LE: loop exit
PB: predicated region body
PF: predicated region fallthrough
CT: control target
= control target key end

     0   :  { %12 = vsyncpa [#allocation4], 0  ;;  %s1378_s0 = inlined_call_operand.vmem [shape: f32[8,500], index: 0, kind: input, shape index: {}]   ;;  %s1379_s1 = inlined_call_operand.hbm [shape: bf16[512,256], index: 1, kind: input, shape index: {}]   ;;  %s1380_s2 = inlined_call_operand.vmem [shape: f32[1,256], index: 2, kind: input, shape index: {}]   ;;  %s1381_s3 = inlined_call_operand.hbm [shape: bf16[256,128], index: 3, kind: input, shape index: {}]   ;;  %s1382_s4 = inlined_call_operand.vmem [shape: f32[1,128], index: 4, kind: input, shape index: {}]   ;;  %s1383_s5 = inlined_call_operand.vmem [shape: bf16[128,2], index: 5, kind: input, shape index: {}]   ;;  %s1384_s6 = inlined_call_operand.vmem [shape: f32[1,2], index: 6, kind: input, shape index: {}]   ;;  %s1385_s7 = inlined_call_operand.vmem [shape: f32[8,2], index: 7, kind: output, shape index: {}]  }
   0x1   :  { %13 = vsyncpa [#allocation6], 0  ;;  %s1227_s24 = smov [#allocation3]   ;;  %s1179_s28 = scalar_lea.hbm %s1379_s1, 8192 }
   0x2   :  { %s21_s25 = sshll.u32 %s1227_s24, 4  ;;  %p1180_p0 = scmp.ne.s32.totalorder %s1379_s1, %s1179_s28  ;;  %s22_s25 = int_to_ptr.vmem [resolvable:$true] %s21_s25 }
   0x3   :  { %p1183_p1 = scmp.lt.u32.totalorder %s1179_s28, %s1379_s1 }
   0x5   :  { %p1185_p2 = pnand %p1183_p1, %p1180_p0 }
   0x7   :  { %1188 = shalt.err (!%p1185_p2)
}
   0x8   :  { %s1189_s10 = scalar_lea.vmem %s22_s25, 8192  ;;  %p1194_p4 = scmp.lt.s32.totalorder %s22_s25, %s22_s25 }
   0x9   :  { %p1190_p3 = scmp.ne.s32.totalorder %s22_s25, %s1189_s10  ;;  %p1195_p5 = scmp.lt.s32.totalorder %s1189_s10, %s1189_s10 }
   0xb   :  { %p1196_p6 = por %p1195_p5, %p1194_p4 }
   0xd   :  { %p1197_p7 = pnand %p1196_p6, %p1190_p3 }
   0xf   :  { %1200 = shalt.err (!%p1197_p7)
}
  0x10   :  { %s1228_s11 = smov 128   ;;  %s1229_s12 = smov 8  }
  0x11   :  { %27 = dma.hbm_to_vmem [thread:$0]  %s1379_s1, 8192, %s22_s25, [#allocation4], %s1228_s11, %s1228_s11, %s1229_s12  }
  0x12   :  { %s1230_s15 = smov [#allocation5]   ;;  %s1201_s19 = scalar_lea.hbm %s1381_s3, 2048 }
  0x13   :  { %s35_s16 = sshll.u32 %s1230_s15, 4  ;;  %p1202_p8 = scmp.ne.s32.totalorder %s1381_s3, %s1201_s19  ;;  %s36_s16 = int_to_ptr.vmem [resolvable:$true] %s35_s16 }
  0x14   :  { %p1205_p9 = scmp.lt.u32.totalorder %s1201_s19, %s1381_s3 }
  0x16   :  { %p1207_p10 = pnand %p1205_p9, %p1202_p8 }
  0x18   :  { %1210 = shalt.err (!%p1207_p10)
}
  0x19   :  { %s1211_s24 = scalar_lea.vmem %s36_s16, 2048  ;;  %p1216_p12 = scmp.lt.s32.totalorder %s36_s16, %s36_s16 }
  0x1a   :  { %p1212_p11 = scmp.ne.s32.totalorder %s36_s16, %s1211_s24  ;;  %p1217_p13 = scmp.lt.s32.totalorder %s1211_s24, %s1211_s24 }
  0x1c   :  { %p1218_p0 = por %p1217_p13, %p1216_p12 }
  0x1e   :  { %p1219_p1 = pnand %p1218_p0, %p1212_p11 }
  0x20   :  { %1222 = shalt.err (!%p1219_p1)
}
  0x21   :  { %s1231_s1 = smov 64   ;;  %s1232_s25 = smov 4  }
  0x22   :  { %41 = dma.hbm_to_vmem [thread:$0]  %s1381_s3, 2048, %s36_s16, [#allocation6], %s1231_s1, %s1231_s1, %s1232_s25  }
  0x23   :  { %1223 = dma.done.wait [#allocation4], 8192  }
  0x24   :  { %1224 = vsyncadd [#allocation4], 4294959104 }
  0x25   :  { %1225 = dma.done.wait [#allocation6], 2048  }
  0x26   :  { %1226 = vsyncadd [#allocation6], 4294965248  ;;  %v1233_v0 = vmov 0   ;;  %v1059_v1 = vld [vmem:[#allocation3 + $0x4] ss:$8 sps:$4 sm:$0xff]   ;;  %v59_v32 = vld [vmem:[%s1378_s0 + $0x18] sm:$0xff] }
  0x27   :  { %55 = vst [vmem:[#allocation2 + $0x18] sm:$0xff] %v1233_v0  ;;  %v1061_v2 = vld [vmem:[#allocation3] ss:$8 sps:$4 sm:$0xff]   ;;  %473 = vmatprep.subr.bf16.mxu0 %v1059_v1  ;;  %v1062_v3 = vld [vmem:[#allocation3 + $0x14] ss:$8 sps:$4 sm:$0xff]   ;;  %vm71_vm0 = vcmask 949248  }
  0x28   :  { %474 = vmatpush1.bf16.msra.mxu0 %v1061_v2  ;;  %v1064_v4 = vld [vmem:[#allocation3 + $0x10] ss:$8 sps:$4 sm:$0xff]   ;;  %v1065_v5 = vld [vmem:[#allocation3 + $0x24] ss:$8 sps:$4 sm:$0xff]   ;;  %v1067_v6 = vld [vmem:[#allocation3 + $0x20] ss:$8 sps:$4 sm:$0xff]  }
  0x29   :  { %475 = vmatprep.subr.bf16.mxu0 %v1062_v3  ;;  %v1068_v7 = vld [vmem:[#allocation3 + $0x34] ss:$8 sps:$4 sm:$0xff]   ;;  %v1070_v8 = vld [vmem:[#allocation3 + $0x30] ss:$8 sps:$4 sm:$0xff]   ;;  %v1071_v9 = vld [vmem:[#allocation3 + $0x44] ss:$8 sps:$4 sm:$0xff]  }
  0x2a   :  { %v1073_v10 = vld [vmem:[#allocation3 + $0x40] ss:$8 sps:$4 sm:$0xff]   ;;  %v1074_v11 = vld [vmem:[#allocation3 + $0x54] ss:$8 sps:$4 sm:$0xff]   ;;  %v1076_v12 = vld [vmem:[#allocation3 + $0x50] ss:$8 sps:$4 sm:$0xff]  }
  0x2b   :  { %v1077_v13 = vld [vmem:[#allocation3 + $0x64] ss:$8 sps:$4 sm:$0xff]   ;;  %v1079_v17 = vld [vmem:[#allocation3 + $0x60] ss:$8 sps:$4 sm:$0xff]   ;;  %v1080_v20 = vld [vmem:[#allocation3 + $0x74] ss:$8 sps:$4 sm:$0xff]  }
  0x2c   :  { %476 = vmatpush1.bf16.msra.mxu0 %v1064_v4  ;;  %v57_v14 = vld [vmem:[%s1378_s0 + $0x8] sm:$0xff]  ;;  %v1309_v18 = vld [vmem:[%s1378_s0] sm:$0xff]  ;;  %v1082_v22 = vld [vmem:[#allocation3 + $0x70] ss:$8 sps:$4 sm:$0xff]   ;;  %vm1235_vm1 = vmmov 0   ;;  %vm856_vm2 = vcmask 15360  }
  0x2d   :  { %477 = vmatprep.subr.bf16.mxu0 %v1065_v5  ;;  %v61_v15 = vld [vmem:[%s1378_s0 + $0x28] sm:$0xff]  ;;  %v1314_v19 = vld [vmem:[%s1378_s0 + $0x20] sm:$0xff]  ;;  %v1086_v25 = vld [vmem:[#allocation3 + $0x94] ss:$8 sps:$4 sm:$0xff]  }
  0x2e   :  { %v65_v16 = vpack.c.bf16 %v61_v15, %v57_v14  ;;  %v64_v21 = vpack.c.bf16 %v1314_v19, %v1309_v18  ;;  %v1083_v23 = vld [vmem:[#allocation3 + $0x84] ss:$8 sps:$4 sm:$0xff]   ;;  %v1085_v24 = vld [vmem:[#allocation3 + $0x80] ss:$8 sps:$4 sm:$0xff]   ;;  %v1088_v26 = vld [vmem:[#allocation3 + $0x90] ss:$8 sps:$4 sm:$0xff]  }
  0x2f   :  { %v1089_v27 = vld [vmem:[#allocation3 + $0xa4] ss:$8 sps:$4 sm:$0xff]   ;;  %v1091_v28 = vld [vmem:[#allocation3 + $0xa0] ss:$8 sps:$4 sm:$0xff]   ;;  %v1092_v29 = vld [vmem:[#allocation3 + $0xb4] ss:$8 sps:$4 sm:$0xff]  }
  0x30   :  { %478 = vmatpush1.bf16.msra.mxu0 %v1067_v6  ;;  %505 = vmatprep.mubr.bf16.mxu0 %v65_v16  ;;  %v1094_v30 = vld [vmem:[#allocation3 + $0xb0] ss:$8 sps:$4 sm:$0xff]   ;;  %v1095_v31 = vld [vmem:[#allocation3 + $0xc4] ss:$8 sps:$4 sm:$0xff]   ;;  %v1097_v35 = vld [vmem:[#allocation3 + $0xc0] ss:$8 sps:$4 sm:$0xff]  }
  0x31   :  { %479 = vmatprep.subr.bf16.mxu0 %v1068_v7  ;;  %v63_v33 = vld [vmem:[%s1378_s0 + $0x38] sm:$0xff]  ;;  %v1327_v34 = vld [vmem:[%s1378_s0 + $0x10] sm:$0xff]  ;;  %v1155_v40 = vld [vmem:[#allocation5 + $0x40] sm:$0xff]  }
  0x32   :  { %v67_v36 = vpack.c.bf16 %v63_v33, %v59_v32  ;;  %v1332_v37 = vld [vmem:[%s1378_s0 + $0x30] sm:$0xff]  ;;  %v1156_v41 = vld [vmem:[#allocation5] sm:$0xff]   ;;  %991 = vmatprep.subr.bf16.mxu1 %v1155_v40  ;;  %v1157_v42 = vld [vmem:[#allocation5 + $0x48] sm:$0xff]  }
  0x33   :  { %v1098_v38 = vld [vmem:[#allocation3 + $0xd4] ss:$8 sps:$4 sm:$0xff]   ;;  %v66_v39 = vpack.c.bf16 %v1332_v37, %v1327_v34  ;;  %992 = vmatpush3.bf16.msra.mxu1 %v1156_v41  ;;  %v1158_v43 = vld [vmem:[#allocation5 + $0x8] sm:$0xff]   ;;  %v1100_v45 = vld [vmem:[#allocation3 + $0xd0] ss:$8 sps:$4 sm:$0xff]  }
  0x34   :  { %480 = vmatpush1.bf16.msra.mxu0 %v1070_v8  ;;  %72 = vst.msk [vmem:[#allocation2 + $0x18] sm:$0xff] %vm71_vm0, %v67_v36  ;;  %993 = vmatprep.subr.bf16.mxu1 %v1157_v42  ;;  %v1159_v44 = vld [vmem:[#allocation5 + $0x50] sm:$0xff]   ;;  %v1101_v46 = vld [vmem:[#allocation3 + $0xe4] ss:$8 sps:$4 sm:$0xff]   ;;  %v1103_v48 = vld [vmem:[#allocation3 + $0xe0] ss:$8 sps:$4 sm:$0xff]  }
  0x35   :  { %481 = vmatprep.subr.bf16.mxu0 %v1071_v9  ;;  %v1160_v47 = vld [vmem:[#allocation5 + $0x10] sm:$0xff]   ;;  %v1161_v49 = vld [vmem:[#allocation5 + $0x58] sm:$0xff]   ;;  %v1163_v52 = vld [vmem:[#allocation5 + $0x60] sm:$0xff]  }
  0x36   :  { %v1104_v50 = vld [vmem:[#allocation3 + $0xf4] ss:$8 sps:$4 sm:$0xff]   ;;  %v1106_v53 = vld [vmem:[#allocation3 + $0xf0] ss:$8 sps:$4 sm:$0xff]   ;;  %v1109_v54 = vld [vmem:[#allocation3 + $0x104] ss:$8 sps:$4 sm:$0xff]  }
  0x37   :  { %994 = vmatpush3.bf16.msra.mxu1 %v1158_v43  ;;  %v1162_v51 = vld [vmem:[#allocation5 + $0x18] sm:$0xff]   ;;  %v1164_v55 = vld [vmem:[#allocation5 + $0x20] sm:$0xff]   ;;  %v1165_v56 = vld [vmem:[#allocation5 + $0x68] sm:$0xff]  }
  0x38   :  { %482 = vmatpush1.bf16.msra.mxu0 %v1073_v10  ;;  %995 = vmatprep.subr.bf16.mxu1 %v1159_v44  ;;  %v1107_v57 = vld [vmem:[#allocation3 + $0x100] ss:$8 sps:$4 sm:$0xff]   ;;  %v1112_v58 = vld [vmem:[#allocation3 + $0x114] ss:$8 sps:$4 sm:$0xff]   ;;  %v1110_v60 = vld [vmem:[#allocation3 + $0x110] ss:$8 sps:$4 sm:$0xff]  }
  0x39   :  { %483 = vmatprep.subr.bf16.mxu0 %v1074_v11  ;;  %v1115_v61 = vld [vmem:[#allocation3 + $0x124] ss:$8 sps:$4 sm:$0xff]   ;;  %v1113_v62 = vld [vmem:[#allocation3 + $0x120] ss:$8 sps:$4 sm:$0xff]   ;;  %v1118_v63 = vld [vmem:[#allocation3 + $0x134] ss:$8 sps:$4 sm:$0xff]  }
  0x3a   :  { %v1116_v0 = vld [vmem:[#allocation3 + $0x130] ss:$8 sps:$4 sm:$0xff]   ;;  %v1121_v1 = vld [vmem:[#allocation3 + $0x144] ss:$8 sps:$4 sm:$0xff]   ;;  %v1119_v2 = vld [vmem:[#allocation3 + $0x140] ss:$8 sps:$4 sm:$0xff]  }
  0x3b   :  { %996 = vmatpush3.bf16.msra.mxu1 %v1160_v47  ;;  %v76_v59 = vld [vmem:[#allocation2 + $0x18] sm:$0xff]  ;;  %v1127_v5 = vld [vmem:[#allocation3 + $0x164] ss:$8 sps:$4 sm:$0xff]   ;;  %v1125_v6 = vld [vmem:[#allocation3 + $0x160] ss:$8 sps:$4 sm:$0xff]  }
  0x3c   :  { %484 = vmatpush1.bf16.msra.mxu0 %v1076_v12  ;;  %997 = vmatprep.subr.bf16.mxu1 %v1161_v49  ;;  %v1124_v3 = vld [vmem:[#allocation3 + $0x154] ss:$8 sps:$4 sm:$0xff]   ;;  %v1122_v4 = vld [vmem:[#allocation3 + $0x150] ss:$8 sps:$4 sm:$0xff]   ;;  %v1133_v9 = vld [vmem:[#allocation3 + $0x184] ss:$8 sps:$4 sm:$0xff]  }
  0x3d   :  { %485 = vmatprep.subr.bf16.mxu0 %v1077_v13  ;;  %v1130_v7 = vld [vmem:[#allocation3 + $0x174] ss:$8 sps:$4 sm:$0xff]   ;;  %v1128_v8 = vld [vmem:[#allocation3 + $0x170] ss:$8 sps:$4 sm:$0xff]   ;;  %v1131_v10 = vld [vmem:[#allocation3 + $0x180] ss:$8 sps:$4 sm:$0xff]  }
  0x3e   :  { %v1136_v11 = vld [vmem:[#allocation3 + $0x194] ss:$8 sps:$4 sm:$0xff]   ;;  %v1134_v12 = vld [vmem:[#allocation3 + $0x190] ss:$8 sps:$4 sm:$0xff]   ;;  %v1139_v13 = vld [vmem:[#allocation3 + $0x1a4] ss:$8 sps:$4 sm:$0xff]  }
  0x3f   :  { %998 = vmatpush3.bf16.msra.mxu1 %v1162_v51  ;;  %v1137_v14 = vld [vmem:[#allocation3 + $0x1a0] ss:$8 sps:$4 sm:$0xff]   ;;  %v1142_v15 = vld [vmem:[#allocation3 + $0x1b4] ss:$8 sps:$4 sm:$0xff]   ;;  %v1140_v16 = vld [vmem:[#allocation3 + $0x1b0] ss:$8 sps:$4 sm:$0xff]  }
  0x40   :  { %486 = vmatpush1.bf16.msra.mxu0 %v1079_v17  ;;  %999 = vmatprep.subr.bf16.mxu1 %v1163_v52  ;;  %v1145_v17 = vld [vmem:[#allocation3 + $0x1c4] ss:$8 sps:$4 sm:$0xff]   ;;  %v1143_v18 = vld [vmem:[#allocation3 + $0x1c0] ss:$8 sps:$4 sm:$0xff]   ;;  %v1148_v19 = vld [vmem:[#allocation3 + $0x1d4] ss:$8 sps:$4 sm:$0xff]  }
  0x41   :  { %487 = vmatprep.subr.bf16.mxu0 %v1080_v20  ;;  %v1146_v20 = vld [vmem:[#allocation3 + $0x1d0] ss:$8 sps:$4 sm:$0xff]   ;;  %v141_v34 = vld [vmem:[%s1380_s2] sm:$0x3] }
  0x42   :  { %v1171_v52 = vld [vmem:[%s1383_s5] sm:$0xff]  }
  0x43   :  { %1000 = vmatpush3.bf16.msra.mxu1 %v1164_v55  ;;  %v1174_v55 = vld [vmem:[%s1383_s5 + $0x18] sm:$0xff]  }
  0x44   :  { %488 = vmatpush1.bf16.msra.mxu0 %v1082_v22  ;;  %1001 = vmatprep.subr.bf16.mxu1 %v1165_v56  ;;  %v1149_v22 = vld [vmem:[#allocation3 + $0x1e0] ss:$8 sps:$4 sm:$0xff]  }
  0x45   :  { %489 = vmatprep.subr.bf16.mxu0 %v1083_v23  ;;  %v1154_v23 = vld [vmem:[#allocation3 + $0x1f4] ss:$8 sps:$4 sm:$0xff]   ;;  %v1175_v56 = vld [vmem:[%s1383_s5 + $0x20] sm:$0xff]  }
  0x48   :  { %490 = vmatpush1.bf16.msra.mxu0 %v1085_v24  ;;  %v1152_v24 = vld [vmem:[#allocation3 + $0x1f0] ss:$8 sps:$4 sm:$0xff]  }
  0x49   :  { %491 = vmatprep.subr.bf16.mxu0 %v1086_v25  ;;  %v1166_v25 = vld [vmem:[#allocation5 + $0x28] sm:$0xff]  }
  0x4a   :  { %1002 = vmatpush3.bf16.msra.mxu1 %v1166_v25 }
  0x4c   :  { %492 = vmatpush1.bf16.msra.mxu0 %v1088_v26  ;;  %v1167_v26 = vld [vmem:[#allocation5 + $0x70] sm:$0xff]  }
  0x4d   :  { %493 = vmatprep.subr.bf16.mxu0 %v1089_v27  ;;  %v1168_v27 = vld [vmem:[#allocation5 + $0x30] sm:$0xff]   ;;  %1003 = vmatprep.subr.bf16.mxu1 %v1167_v26 }
  0x4e   :  { %1004 = vmatpush3.bf16.msra.mxu1 %v1168_v27 }
  0x50   :  { %494 = vmatpush1.bf16.msra.mxu0 %v1091_v28  ;;  %v1169_v28 = vld [vmem:[#allocation5 + $0x78] sm:$0xff]  }
  0x51   :  { %495 = vmatprep.subr.bf16.mxu0 %v1092_v29  ;;  %v1170_v29 = vld [vmem:[#allocation5 + $0x38] sm:$0xff]   ;;  %1005 = vmatprep.subr.bf16.mxu1 %v1169_v28 }
  0x52   :  { %1006 = vmatpush3.bf16.msra.mxu1 %v1170_v29 }
  0x54   :  { %496 = vmatpush1.bf16.msra.mxu0 %v1094_v30  ;;  %v1234_v30 = vmov 0.0  }
  0x55   :  { %497 = vmatprep.subr.bf16.mxu0 %v1095_v31  ;;  %1022 = vmatprep.subr.bf16.mxu1 %v1234_v30  ;;  %v143_v31 = vlaneseq }
  0x57   :  { %v144_v32 = vshrl.u32 %v143_v31, 7 }
  0x58   :  { %498 = vmatpush1.bf16.msra.mxu0 %v1097_v35 }
  0x59   :  { %499 = vmatprep.subr.bf16.mxu0 %v1098_v38  ;;  %v145_v33 = vsub.s32 0, %v144_v32  ;;  %v149_v35 = vsub.s32 1, %v144_v32 }
  0x5b   :  { %v146_v36 = vrot.slane %v141_v34, %v145_v33  ;;  %v150_v37 = vrot.slane %v141_v34, %v149_v35 }
  0x5c   :  { %500 = vmatpush1.bf16.msra.mxu0 %v1100_v45 }
  0x5d   :  { %501 = vmatprep.subr.bf16.mxu0 %v1101_v46 }
  0x60   :  { %502 = vmatpush1.bf16.msra.mxu0 %v1103_v48 }
  0x61   :  { %503 = vmatprep.subr.bf16.mxu0 %v1104_v50 }
  0x64   :  { %504 = vmatpush1.bf16.msra.mxu0 %v1106_v53  ;;  %v1172_v53 = vld [vmem:[%s1383_s5 + $0x8] sm:$0xff]  }
  0x65   :  { %516 = vmatprep.subr.bf16.mxu0 %v1109_v54  ;;  %v1173_v54 = vld [vmem:[%s1383_s5 + $0x10] sm:$0xff]  }
  0x67   :  { %506 = vmatmul.mubr.bf16.vlgmr.msra.gmra.mrb[0].mxu0 %v64_v21  ;;  %v1151_v21 = vld [vmem:[#allocation3 + $0x1e4] ss:$8 sps:$4 sm:$0xff]  }
  0x68   :  { %517 = vmatpush1.bf16.msra.mxu0 %v1107_v57  ;;  %548 = vmatprep.mubr.bf16.mxu0 %v76_v59  ;;  %v1176_v57 = vld [vmem:[%s1383_s5 + $0x28] sm:$0xff]   ;;  %v1178_v59 = vld [vmem:[%s1383_s5 + $0x38] sm:$0xff]  }
  0x69   :  { %518 = vmatprep.subr.bf16.mxu0 %v1112_v58  ;;  %v1177_v58 = vld [vmem:[%s1383_s5 + $0x30] sm:$0xff]  }
  0x6c   :  { %519 = vmatpush1.bf16.msra.mxu0 %v1110_v60 }
  0x6d   :  { %520 = vmatprep.subr.bf16.mxu0 %v1115_v61  ;;  %v965_v61 = vld [vmem:[%s1382_s4] ss:$0 sm:$0xff] }
  0x70   :  { %521 = vmatpush1.bf16.msra.mxu0 %v1113_v62 }
  0x71   :  { %522 = vmatprep.subr.bf16.mxu0 %v1118_v63 }
  0x74   :  { %523 = vmatpush1.bf16.msra.mxu0 %v1116_v0 }
  0x75   :  { %524 = vmatprep.subr.bf16.mxu0 %v1121_v1 }
  0x78   :  { %525 = vmatpush1.bf16.msra.mxu0 %v1119_v2 }
  0x79   :  { %526 = vmatprep.subr.bf16.mxu0 %v1124_v3 }
  0x7c   :  { %527 = vmatpush1.bf16.msra.mxu0 %v1122_v4 }
  0x7d   :  { %528 = vmatprep.subr.bf16.mxu0 %v1127_v5 }
  0x80   :  { %529 = vmatpush1.bf16.msra.mxu0 %v1125_v6 }
  0x81   :  { %530 = vmatprep.subr.bf16.mxu0 %v1130_v7 }
  0x84   :  { %531 = vmatpush1.bf16.msra.mxu0 %v1128_v8  ;;  %v982_v8 = vld [vmem:[%s1384_s6] ss:$0 sm:$0xff] }
  0x85   :  { %532 = vmatprep.subr.bf16.mxu0 %v1133_v9 }
  0x88   :  { %533 = vmatpush1.bf16.msra.mxu0 %v1131_v10 }
  0x89   :  { %534 = vmatprep.subr.bf16.mxu0 %v1136_v11 }
  0x8c   :  { %535 = vmatpush1.bf16.msra.mxu0 %v1134_v12 }
  0x8d   :  { %536 = vmatprep.subr.bf16.mxu0 %v1139_v13 }
  0x90   :  { %537 = vmatpush1.bf16.msra.mxu0 %v1137_v14 }
  0x91   :  { %538 = vmatprep.subr.bf16.mxu0 %v1142_v15 }
  0x94   :  { %539 = vmatpush1.bf16.msra.mxu0 %v1140_v16 }
  0x95   :  { %540 = vmatprep.subr.bf16.mxu0 %v1145_v17 }
  0x98   :  { %541 = vmatpush1.bf16.msra.mxu0 %v1143_v18 }
  0x99   :  { %542 = vmatprep.subr.bf16.mxu0 %v1148_v19 }
  0x9c   :  { %543 = vmatpush1.bf16.msra.mxu0 %v1146_v20 }
  0x9d   :  { %544 = vmatprep.subr.bf16.mxu0 %v1151_v21 }
  0xa0   :  { %545 = vmatpush1.bf16.msra.mxu0 %v1149_v22 }
  0xa1   :  { %546 = vmatprep.subr.bf16.mxu0 %v1154_v23 }
  0xa4   :  { %547 = vmatpush1.bf16.msra.mxu0 %v1152_v24 }
  0xa7   :  { %549 = vmatmul.mubr.bf16.vlgmr.msra.gmra.mrb[0].mxu0 %v66_v39 }
 0x17a   :  { %v550_v38 = vpop.f32.mrb[0].mxu0 }
 0x17b   :  { %v1042_v39 = vadd.f32 %v550_v38, %v146_v36  ;;  %v552_v40 = vpop.f32.mrb[1].mxu0 }
 0x17c   :  { %v1043_v41 = vadd.f32 %v552_v40, %v150_v37  ;;  %v554_v42 = vpop.f32.mrb[2].mxu0 }
 0x17d   :  { %v1044_v43 = vadd.f32 %v554_v42, %v146_v36  ;;  %v556_v44 = vpop.f32.mrb[3].mxu0  ;;  %v559_v46 = vmax.f32 %v1042_v39, 0.0 }
 0x17e   :  { %v1045_v45 = vadd.f32 %v556_v44, %v150_v37  ;;  %v560_v48 = vmax.f32 %v1043_v41, 0.0 }
 0x17f   :  { %v561_v47 = vmax.f32 %v1044_v43, 0.0 }
 0x180   :  { %v562_v49 = vmax.f32 %v1045_v45, 0.0 }
 0x181   :  { %v563_v50 = vpack.c.bf16 %v561_v47, %v559_v46 }
 0x182   :  { %v564_v51 = vpack.c.bf16 %v562_v49, %v560_v48 }
 0x184   :  { %732 = vmatprep.mubr.bf16.mxu1 %v564_v51 }
 0x185   :  { %733 = vmatmul.mubr.bf16.vlgmr.msra.gmra.mrb[0].mxu1 %v563_v50 }
 0x186   :  { %1023 = vmatpush3.bf16.msra.mxu1 %v1171_v52  ;;  %1038 = vmatprep.mubr.msk.bf16.mxu1 %vm1235_vm1, %v1234_v30 }
 0x187   :  { %1024 = vmatprep.subr.bf16.mxu1 %v1234_v30 }
 0x18a   :  { %1025 = vmatpush3.bf16.msra.mxu1 %v1172_v53 }
 0x18b   :  { %1026 = vmatprep.subr.bf16.mxu1 %v1234_v30 }
 0x18e   :  { %1027 = vmatpush3.bf16.msra.mxu1 %v1173_v54 }
 0x18f   :  { %1028 = vmatprep.subr.bf16.mxu1 %v1234_v30 }
 0x192   :  { %1029 = vmatpush3.bf16.msra.mxu1 %v1174_v55 }
 0x193   :  { %1030 = vmatprep.subr.bf16.mxu1 %v1234_v30 }
 0x196   :  { %1031 = vmatpush3.bf16.msra.mxu1 %v1175_v56 }
 0x197   :  { %1032 = vmatprep.subr.bf16.mxu1 %v1234_v30 }
 0x19a   :  { %1033 = vmatpush3.bf16.msra.mxu1 %v1176_v57 }
 0x19b   :  { %1034 = vmatprep.subr.bf16.mxu1 %v1234_v30 }
 0x19e   :  { %1035 = vmatpush3.bf16.msra.mxu1 %v1177_v58 }
 0x19f   :  { %1036 = vmatprep.subr.bf16.mxu1 %v1234_v30 }
 0x1a2   :  { %1037 = vmatpush3.bf16.msra.mxu1 %v1178_v59 }
 0x258   :  { %v1007_v60 = vpop.f32.mrb[0].mxu1 }
 0x259   :  { %v1008_v62 = vpop.f32.mrb[1].mxu1 }
 0x25a   :  { %v1009_v63 = vadd.f32 %v1008_v62, %v1007_v60  ;;  %v1010_v0 = vpop.f32.mrb[2].mxu1 }
 0x25b   :  { %v1011_v1 = vpop.f32.mrb[3].mxu1 }
 0x25c   :  { %v735_v2 = vadd.f32 %v1009_v63, %v965_v61  ;;  %v1012_v3 = vadd.f32 %v1011_v1, %v1010_v0 }
 0x25e   :  { %v738_v4 = vadd.f32 %v1012_v3, %v965_v61  ;;  %v741_v5 = vmax.f32 %v735_v2, 0.0 }
 0x260   :  { %v742_v6 = vmax.f32 %v738_v4, 0.0 }
 0x262   :  { %v743_v7 = vpack.c.bf16 %v742_v6, %v741_v5 }
 0x264   :  { %1039 = vmatmul.mubr.bf16.vlgmr.msra.gmra.mrb[4].mxu1 %v743_v7 }
 0x337   :  { %v849_v9 = vpop.f32.mrb[4].mxu1 }
 0x338   :  { %v850_v10 = vadd.f32 %v982_v8, %v849_v9  ;;  %v1040_v11 = vpop.f32.mrb[5].mxu1 }
 0x339   :  { %v852_v12 = vpop.f32.mrb[6].mxu1 }
 0x33a   :  { %857 = vst.msk [vmem:[#allocation7] sm:$0xff] %vm856_vm2, %v850_v10  ;;  %v1041_v13 = vpop.f32.mrb[7].mxu1 }
 0x341   :  { %v888_v14 = vld [vmem:[#allocation7] sm:$0xff] }
 0x342   :  { %889 = vst [vmem:[%s1385_s7] sm:$0xff] %v888_v14 }
 0x343   :  { %895 = vsyncpa [#allocation4], 1 }
 0x344   :  { %896 = vsyncpa [#allocation6], 1 }

</bundles_post_ra>
